<compile_context>
chip_gen: v5e
topology: v5e:2x2
jax: 0.10.0
libtpu: 0.0.40
codegen_flags: <defaults>
</compile_context>

<pallas_src>
import functools

import numpy as np
import jax
import jax.numpy as jnp
from jax.experimental import pallas as pl
from jax.experimental.pallas import tpu as pltpu


TC_TILE = 8  # class rows per added_weights output tile (sublane tile)


def _pad_to(n, m):
    return ((n + m - 1) // m) * m


def _vmem_budget():
    """Usable scoped-VMEM budget for this generation (bytes)."""
    try:
        cap = int(pltpu.get_tpu_info().vmem_capacity_bytes)
    except Exception:
        cap = 64 * 1024 * 1024            # conservative (v7x per-TensorCore)
    return min((cap * 3) // 4, 112 << 20)  # ~96 MiB v5e/v6e, ~48 MiB v7x


# --------------------------------------------------------------------------- #
# Kernel 1: added_weights[c] = sum of weight rows on class c's tree path.
# Grid = (TCP // TC_TILE,).  The whole padded weight is VMEM-resident and the
# TC_TILE * max_depth row gathers run as an unrolled in-kernel loop.
# --------------------------------------------------------------------------- #
def gather_aw_kernel(idx_ref, w_ref, aw_ref, *, tc_tile, max_depth):
    # idx_ref : SMEM int32, flattened (TCP, max_depth) tree-node index table.
    # w_ref   : (CN_P, DP) f32, full padded weight (resident in VMEM).
    # aw_ref  : (TC_TILE, DP) f32 output tile.
    ct = pl.program_id(0)
    dp = aw_ref.shape[1]
    base = ct * (tc_tile * max_depth)
    for lc in range(tc_tile):                     # static unroll: 8 classes/tile
        acc = jnp.zeros((1, dp), jnp.float32)     # per-class accumulator
        for d in range(max_depth):                # static unroll: tree depth
            node = idx_ref[base + lc * max_depth + d]
            acc = acc + w_ref[pl.ds(node, 1), :]  # dynamic-row gather (VMEM)
        aw_ref[pl.ds(lc, 1), :] = acc             # single row store per class


# --------------------------------------------------------------------------- #
# Kernel 2: logits = x @ added_weights.T  (bf16 MXU, f32 acc) + fused softmax CE.
# --------------------------------------------------------------------------- #
def logits_ce_kernel(x_ref, awt_ref, y_ref, logits_ref, loss_ref, *,
                     true_classnum, td):
    # x_ref      : (TB, TD)              f32 (cast to bf16 just before the MXU)
    # awt_ref    : (TD, TCP) or (DP, TCP) bf16 (streamed panel / fully resident)
    # y_ref      : (TB, 1)               int32
    # logits_ref : (TB, TCP)             f32 (doubles as the matmul accumulator)
    # loss_ref   : (TB, 1)               f32 per-example CE loss
    k = pl.program_id(1)

    @pl.when(k == 0)
    def _init():
        logits_ref[...] = jnp.zeros_like(logits_ref)

    if awt_ref.shape[0] == td:          # streamed (TD, TCP) reduction panel
        awt = awt_ref[...]
    else:                               # fully resident (DP, TCP): slice chunk k
        koff = pl.multiple_of(k * td, td)
        awt = awt_ref[pl.ds(koff, td), :]

    logits_ref[...] += jnp.dot(x_ref[...].astype(jnp.bfloat16), awt,
                               preferred_element_type=jnp.float32)

    @pl.when(k == pl.num_programs(1) - 1)
    def _finalize():
        logits = logits_ref[...]
        tb, tcp = logits.shape
        col = jax.lax.broadcasted_iota(jnp.int32, (tb, tcp), 1)
        # f32 softmax/CE math throughout (v5e has no bf16 VPU/EUP; -1e30 is f32-safe).
        masked = jnp.where(col < true_classnum, logits, jnp.float32(-1e30))
        m = jnp.max(masked, axis=-1, keepdims=True)
        lse = m + jnp.log(jnp.sum(jnp.exp(masked - m), axis=-1, keepdims=True))
        tgt = jnp.sum(jnp.where(col == y_ref[...], logits, 0.0),
                      axis=-1, keepdims=True)
        loss_ref[...] = lse - tgt


# --------------------------------------------------------------------------- #
# Wrapper
# --------------------------------------------------------------------------- #
def _build_index_table(new2index, true_classnum, padded_rows, zero_row):
    max_depth = max(len(new2index[c]) for c in range(true_classnum))
    tbl = np.full((padded_rows, max_depth), zero_row, dtype=np.int32)
    for c in range(true_classnum):
        for j, node in enumerate(new2index[c]):
            tbl[c, j] = int(node)
    return tbl, max_depth


def mod_forward(weight, x, y, new2index, true_classnum):
    """Returns (loss, logits, weight, added_weights) like Mod.forward."""
    class_num, dimension = weight.shape
    batch = x.shape[0]
    usable_vmem = _vmem_budget()

    # ---- padded geometry ----------------------------------------------------
    DP = _pad_to(dimension, 128)          # feature dim, lane-aligned (no inflation)
    TCP = _pad_to(true_classnum, 128)     # lane-dense class dim
    CN_P = _pad_to(class_num + 1, 8)      # +1 all-zero sentinel row for short paths
    zero_row = class_num

    # Batch tile: 256 fills the v6e/v7x MXU M dim for big batches; otherwise keep
    # >= 2 batch tiles when possible so v7x megacore gets work on both cores.
    if batch >= 512:
        TB = 256
    elif batch >= 256:
        TB = 128
    elif batch >= 16:
        TB = _pad_to((batch + 1) // 2, 8)
    else:
        TB = _pad_to(batch, 8)
    BP = _pad_to(batch, TB)

    # Feature-reduction tile + added_weights^T residency, sized to this chip's VMEM.
    def _k2_need(td, resident):
        x_buf = 2 * TB * td * 4                          # double-buffered f32 x tile
        awt_buf = 2 * (DP if resident else td) * TCP * 2  # bf16 awT buffers
        out_buf = 2 * TB * TCP * 4 + 4 * TB * 4           # logits + loss + y
        return x_buf + awt_buf + out_buf + (2 << 20)

    td_opts = [t for t in (512, 256, 128) if DP % t == 0]
    TD = next((t for t in td_opts if _k2_need(t, False) <= usable_vmem),
              td_opts[-1])
    awt_resident = _k2_need(TD, True) <= usable_vmem
    vmem2 = int(min(max(_k2_need(TD, awt_resident) + (4 << 20), 32 << 20),
                    usable_vmem))

    # ---- host-side tree-path index table (scalar prefetch operand) ----------
    tbl, max_depth = _build_index_table(new2index, true_classnum, TCP, zero_row)
    idx_flat = jnp.asarray(tbl.reshape(-1))

    w_pad = jnp.pad(weight.astype(jnp.float32),
                    ((0, CN_P - class_num), (0, DP - dimension)))

    # ---- kernel 1: VMEM-resident weight, in-kernel gather-sum ---------------
    # TODO(synk): if CN_P*DP*4 ever exceeds the VMEM budget, switch kernel 1 to a
    # manual double-buffered row-DMA variant (memory_space=pl.ANY + make_async_copy).
    vmem1 = int(min(max(2 * CN_P * DP * 4 + 2 * TC_TILE * DP * 4 + (2 << 20),
                        8 << 20), usable_vmem))
    kern1 = functools.partial(gather_aw_kernel, tc_tile=TC_TILE,
                              max_depth=max_depth)
    aw_pad = pl.pallas_call(
        kern1,
        out_shape=jax.ShapeDtypeStruct((TCP, DP), jnp.float32),
        grid_spec=pltpu.PrefetchScalarGridSpec(
            num_scalar_prefetch=1,
            grid=(TCP // TC_TILE,),
            in_specs=[pl.BlockSpec((CN_P, DP), lambda ct, idx: (0, 0))],
            out_specs=pl.BlockSpec((TC_TILE, DP), lambda ct, idx: (ct, 0)),
        ),
        compiler_params=pltpu.CompilerParams(
            dimension_semantics=("parallel",),
            vmem_limit_bytes=vmem1),
        cost_estimate=pl.CostEstimate(
            flops=TCP * max_depth * DP,
            transcendentals=0,
            bytes_accessed=CN_P * DP * 4 + TCP * DP * 4),
    )(idx_flat, w_pad)

    # ---- kernel 2 operands (exact shapes; bf16 before transpose; jnp.pad only)
    awT = aw_pad.astype(jnp.bfloat16).T            # (DP, TCP); half the f32 bytes
    x32 = x.astype(jnp.float32)
    if BP != batch or DP != dimension:
        x32 = jnp.pad(x32, ((0, BP - batch), (0, DP - dimension)))
    y2 = y.astype(jnp.int32).reshape(batch, 1)
    if BP != batch:
        y2 = jnp.pad(y2, ((0, BP - batch), (0, 0)))

    if awt_resident:
        awt_spec = pl.BlockSpec((DP, TCP), lambda i, k: (0, 0))   # one HBM pass
    else:
        awt_spec = pl.BlockSpec((TD, TCP), lambda i, k: (k, 0))   # streamed
        # TODO(synk): for very large TCP add class tiling + online-softmax finalize
        # so the (TB, TCP) logits block no longer has to be whole.

    kern2 = functools.partial(logits_ce_kernel, true_classnum=true_classnum,
                              td=TD)
    logits_pad, per_ex = pl.pallas_call(
        kern2,
        out_shape=(jax.ShapeDtypeStruct((BP, TCP), jnp.float32),
                   jax.ShapeDtypeStruct((BP, 1), jnp.float32)),
        grid_spec=pltpu.PrefetchScalarGridSpec(
            num_scalar_prefetch=0,
            grid=(BP // TB, DP // TD),
            in_specs=[pl.BlockSpec((TB, TD), lambda i, k: (i, k)),
                      awt_spec,
                      pl.BlockSpec((TB, 1), lambda i, k: (i, 0))],
            out_specs=(pl.BlockSpec((TB, TCP), lambda i, k: (i, 0)),
                       pl.BlockSpec((TB, 1), lambda i, k: (i, 0))),
        ),
        compiler_params=pltpu.CompilerParams(
            dimension_semantics=("parallel", "arbitrary"),
            vmem_limit_bytes=vmem2),
        cost_estimate=pl.CostEstimate(
            flops=2 * BP * DP * TCP + 6 * BP * TCP,
            transcendentals=BP * TCP + BP,
            bytes_accessed=(BP * DP * 4
                            + DP * TCP * 2 * (1 if awt_resident else BP // TB)
                            + BP * TCP * 4 + BP * 8)),
    )(x32, awT, y2)

    added_weights = aw_pad[:true_classnum, :dimension]
    logits = logits_pad[:batch, :true_classnum]
    loss = jnp.sum(per_ex[:batch, 0]) / batch       # mean reduction (wrapper-side)
    return loss, logits, weight, added_weights


if __name__ == "__main__":
    # Small synthetic cover tree: 8 leaves (true classes), binary internal
    # nodes 8..13, root 14  ->  class_num = 15 total tree nodes.
    true_classnum = 8
    class_num = 15
    dimension = 32
    batch = 8
    new2index = {c: [c, 8 + c // 2, 12 + c // 4, 14] for c in range(true_classnum)}

    key = jax.random.PRNGKey(0)
    k_w, k_x, k_y = jax.random.split(key, 3)

    # Deterministic init for nn.Linear(dimension, class_num, bias=False).weight
    bound = 1.0 / (dimension ** 0.5)
    weight = jax.random.uniform(
        k_w, (class_num, dimension), jnp.float32, minval=-bound, maxval=bound)

    x = jax.random.normal(k_x, (batch, dimension), jnp.float32)
    y = jax.random.randint(k_y, (batch,), 0, true_classnum, jnp.int32)

    loss, logits, w_out, added_weights = mod_forward(
        weight, x, y, new2index, true_classnum)
    jax.block_until_ready((loss, logits, w_out, added_weights))

    # ---- pure-JAX f32 reference ---------------------------------------------
    path = np.zeros((true_classnum, class_num), np.float32)
    for c in range(true_classnum):
        for node in new2index[c]:
            path[c, node] = 1.0
    aw_ref = jnp.asarray(path) @ weight
    logits_ref = x @ aw_ref.T
    lse = jax.nn.logsumexp(logits_ref, axis=-1)
    loss_ref = jnp.mean(lse - logits_ref[jnp.arange(batch), y])

    assert jnp.allclose(added_weights, aw_ref, atol=1e-5)
    # logits/loss use bf16 MXU operands (f32 accumulation) -> modest tolerance.
    assert jnp.allclose(logits, logits_ref, atol=1e-1, rtol=5e-2)
    assert jnp.allclose(loss, loss_ref, atol=5e-2, rtol=5e-2)

    print("KERNEL_OK")
</pallas_src>

<mosaic_0001>
module attributes {stable_mosaic.version = 11 : i64} {
  func.func @gather_aw_kernel(%arg0: i32, %arg1: memref<512xi32, #tpu.memory_space<smem>>, %arg2: memref<16x128xf32, #tpu.memory_space<vmem>>, %arg3: memref<8x128xf32, #tpu.memory_space<vmem>>) attributes {dimension_semantics = [#tpu.dimension_semantics<parallel>], iteration_bounds = array<i64: 16>, scalar_prefetch = 1 : i64, scratch_operands = 0 : i64, tpu.core_type = #tpu.core_type<tc>, window_params = [{pipeline_mode = #tpu.pipeline_mode<synchronous>, transform_indices = @transform_0, window_bounds = array<i64: 16, 128>}, {transform_indices = @transform_1, window_bounds = array<i64: 8, 128>}]} {
    %c32_i32 = arith.constant 32 : i32
    %0 = arith.muli %arg0, %c32_i32 : i32
    %cst = arith.constant 0.000000e+00 : f32
    %1 = vector.broadcast %cst : f32 to vector<1x128xf32>
    %c0_i32 = arith.constant 0 : i32
    %2 = arith.addi %0, %c0_i32 : i32
    %c0_i32_0 = arith.constant 0 : i32
    %3 = arith.addi %2, %c0_i32_0 : i32
    %4 = arith.index_cast %3 : i32 to index
    %5 = memref.load %arg1[%4] : memref<512xi32, #tpu.memory_space<smem>>
    %6 = arith.index_cast %5 : i32 to index
    %c0 = arith.constant 0 : index
    %7 = vector.load %arg2[%6, %c0] : memref<16x128xf32, #tpu.memory_space<vmem>>, vector<1x128xf32>
    %8 = arith.addf %1, %7 : vector<1x128xf32>
    %c0_i32_1 = arith.constant 0 : i32
    %9 = arith.addi %0, %c0_i32_1 : i32
    %c1_i32 = arith.constant 1 : i32
    %10 = arith.addi %9, %c1_i32 : i32
    %11 = arith.index_cast %10 : i32 to index
    %12 = memref.load %arg1[%11] : memref<512xi32, #tpu.memory_space<smem>>
    %13 = arith.index_cast %12 : i32 to index
    %c0_2 = arith.constant 0 : index
    %14 = vector.load %arg2[%13, %c0_2] : memref<16x128xf32, #tpu.memory_space<vmem>>, vector<1x128xf32>
    %15 = arith.addf %8, %14 : vector<1x128xf32>
    %c0_i32_3 = arith.constant 0 : i32
    %16 = arith.addi %0, %c0_i32_3 : i32
    %c2_i32 = arith.constant 2 : i32
    %17 = arith.addi %16, %c2_i32 : i32
    %18 = arith.index_cast %17 : i32 to index
    %19 = memref.load %arg1[%18] : memref<512xi32, #tpu.memory_space<smem>>
    %20 = arith.index_cast %19 : i32 to index
    %c0_4 = arith.constant 0 : index
    %21 = vector.load %arg2[%20, %c0_4] : memref<16x128xf32, #tpu.memory_space<vmem>>, vector<1x128xf32>
    %22 = arith.addf %15, %21 : vector<1x128xf32>
    %c0_i32_5 = arith.constant 0 : i32
    %23 = arith.addi %0, %c0_i32_5 : i32
    %c3_i32 = arith.constant 3 : i32
    %24 = arith.addi %23, %c3_i32 : i32
    %25 = arith.index_cast %24 : i32 to index
    %26 = memref.load %arg1[%25] : memref<512xi32, #tpu.memory_space<smem>>
    %27 = arith.index_cast %26 : i32 to index
    %c0_6 = arith.constant 0 : index
    %28 = vector.load %arg2[%27, %c0_6] : memref<16x128xf32, #tpu.memory_space<vmem>>, vector<1x128xf32>
    %29 = arith.addf %22, %28 : vector<1x128xf32>
    %c0_7 = arith.constant 0 : index
    %c0_8 = arith.constant 0 : index
    %30 = vector.load %arg3[%c0_7, %c0_8] : memref<8x128xf32, #tpu.memory_space<vmem>>, vector<1x128xf32>
    tpu.vector_store %arg3[%c0_7, %c0_8], %29 {strides = array<i32>} : memref<8x128xf32, #tpu.memory_space<vmem>>, vector<1x128xf32>,
    %cst_9 = arith.constant 0.000000e+00 : f32
    %31 = vector.broadcast %cst_9 : f32 to vector<1x128xf32>
    %c4_i32 = arith.constant 4 : i32
    %32 = arith.addi %0, %c4_i32 : i32
    %c0_i32_10 = arith.constant 0 : i32
    %33 = arith.addi %32, %c0_i32_10 : i32
    %34 = arith.index_cast %33 : i32 to index
    %35 = memref.load %arg1[%34] : memref<512xi32, #tpu.memory_space<smem>>
    %36 = arith.index_cast %35 : i32 to index
    %c0_11 = arith.constant 0 : index
    %37 = vector.load %arg2[%36, %c0_11] : memref<16x128xf32, #tpu.memory_space<vmem>>, vector<1x128xf32>
    %38 = arith.addf %31, %37 : vector<1x128xf32>
    %c4_i32_12 = arith.constant 4 : i32
    %39 = arith.addi %0, %c4_i32_12 : i32
    %c1_i32_13 = arith.constant 1 : i32
    %40 = arith.addi %39, %c1_i32_13 : i32
    %41 = arith.index_cast %40 : i32 to index
    %42 = memref.load %arg1[%41] : memref<512xi32, #tpu.memory_space<smem>>
    %43 = arith.index_cast %42 : i32 to index
    %c0_14 = arith.constant 0 : index
    %44 = vector.load %arg2[%43, %c0_14] : memref<16x128xf32, #tpu.memory_space<vmem>>, vector<1x128xf32>
    %45 = arith.addf %38, %44 : vector<1x128xf32>
    %c4_i32_15 = arith.constant 4 : i32
    %46 = arith.addi %0, %c4_i32_15 : i32
    %c2_i32_16 = arith.constant 2 : i32
    %47 = arith.addi %46, %c2_i32_16 : i32
    %48 = arith.index_cast %47 : i32 to index
    %49 = memref.load %arg1[%48] : memref<512xi32, #tpu.memory_space<smem>>
    %50 = arith.index_cast %49 : i32 to index
    %c0_17 = arith.constant 0 : index
    %51 = vector.load %arg2[%50, %c0_17] : memref<16x128xf32, #tpu.memory_space<vmem>>, vector<1x128xf32>
    %52 = arith.addf %45, %51 : vector<1x128xf32>
    %c4_i32_18 = arith.constant 4 : i32
    %53 = arith.addi %0, %c4_i32_18 : i32
    %c3_i32_19 = arith.constant 3 : i32
    %54 = arith.addi %53, %c3_i32_19 : i32
    %55 = arith.index_cast %54 : i32 to index
    %56 = memref.load %arg1[%55] : memref<512xi32, #tpu.memory_space<smem>>
    %57 = arith.index_cast %56 : i32 to index
    %c0_20 = arith.constant 0 : index
    %58 = vector.load %arg2[%57, %c0_20] : memref<16x128xf32, #tpu.memory_space<vmem>>, vector<1x128xf32>
    %59 = arith.addf %52, %58 : vector<1x128xf32>
    %c1 = arith.constant 1 : index
    %c0_21 = arith.constant 0 : index
    %60 = vector.load %arg3[%c1, %c0_21] : memref<8x128xf32, #tpu.memory_space<vmem>>, vector<1x128xf32>
    tpu.vector_store %arg3[%c1, %c0_21], %59 {strides = array<i32>} : memref<8x128xf32, #tpu.memory_space<vmem>>, vector<1x128xf32>,
    %cst_22 = arith.constant 0.000000e+00 : f32
    %61 = vector.broadcast %cst_22 : f32 to vector<1x128xf32>
    %c8_i32 = arith.constant 8 : i32
    %62 = arith.addi %0, %c8_i32 : i32
    %c0_i32_23 = arith.constant 0 : i32
    %63 = arith.addi %62, %c0_i32_23 : i32
    %64 = arith.index_cast %63 : i32 to index
    %65 = memref.load %arg1[%64] : memref<512xi32, #tpu.memory_space<smem>>
    %66 = arith.index_cast %65 : i32 to index
    %c0_24 = arith.constant 0 : index
    %67 = vector.load %arg2[%66, %c0_24] : memref<16x128xf32, #tpu.memory_space<vmem>>, vector<1x128xf32>
    %68 = arith.addf %61, %67 : vector<1x128xf32>
    %c8_i32_25 = arith.constant 8 : i32
    %69 = arith.addi %0, %c8_i32_25 : i32
    %c1_i32_26 = arith.constant 1 : i32
    %70 = arith.addi %69, %c1_i32_26 : i32
    %71 = arith.index_cast %70 : i32 to index
    %72 = memref.load %arg1[%71] : memref<512xi32, #tpu.memory_space<smem>>
    %73 = arith.index_cast %72 : i32 to index
    %c0_27 = arith.constant 0 : index
    %74 = vector.load %arg2[%73, %c0_27] : memref<16x128xf32, #tpu.memory_space<vmem>>, vector<1x128xf32>
    %75 = arith.addf %68, %74 : vector<1x128xf32>
    %c8_i32_28 = arith.constant 8 : i32
    %76 = arith.addi %0, %c8_i32_28 : i32
    %c2_i32_29 = arith.constant 2 : i32
    %77 = arith.addi %76, %c2_i32_29 : i32
    %78 = arith.index_cast %77 : i32 to index
    %79 = memref.load %arg1[%78] : memref<512xi32, #tpu.memory_space<smem>>
    %80 = arith.index_cast %79 : i32 to index
    %c0_30 = arith.constant 0 : index
    %81 = vector.load %arg2[%80, %c0_30] : memref<16x128xf32, #tpu.memory_space<vmem>>, vector<1x128xf32>
    %82 = arith.addf %75, %81 : vector<1x128xf32>
    %c8_i32_31 = arith.constant 8 : i32
    %83 = arith.addi %0, %c8_i32_31 : i32
    %c3_i32_32 = arith.constant 3 : i32
    %84 = arith.addi %83, %c3_i32_32 : i32
    %85 = arith.index_cast %84 : i32 to index
    %86 = memref.load %arg1[%85] : memref<512xi32, #tpu.memory_space<smem>>
    %87 = arith.index_cast %86 : i32 to index
    %c0_33 = arith.constant 0 : index
    %88 = vector.load %arg2[%87, %c0_33] : memref<16x128xf32, #tpu.memory_space<vmem>>, vector<1x128xf32>
    %89 = arith.addf %82, %88 : vector<1x128xf32>
    %c2 = arith.constant 2 : index
    %c0_34 = arith.constant 0 : index
    %90 = vector.load %arg3[%c2, %c0_34] : memref<8x128xf32, #tpu.memory_space<vmem>>, vector<1x128xf32>
    tpu.vector_store %arg3[%c2, %c0_34], %89 {strides = array<i32>} : memref<8x128xf32, #tpu.memory_space<vmem>>, vector<1x128xf32>,
    %cst_35 = arith.constant 0.000000e+00 : f32
    %91 = vector.broadcast %cst_35 : f32 to vector<1x128xf32>
    %c12_i32 = arith.constant 12 : i32
    %92 = arith.addi %0, %c12_i32 : i32
    %c0_i32_36 = arith.constant 0 : i32
    %93 = arith.addi %92, %c0_i32_36 : i32
    %94 = arith.index_cast %93 : i32 to index
    %95 = memref.load %arg1[%94] : memref<512xi32, #tpu.memory_space<smem>>
    %96 = arith.index_cast %95 : i32 to index
    %c0_37 = arith.constant 0 : index
    %97 = vector.load %arg2[%96, %c0_37] : memref<16x128xf32, #tpu.memory_space<vmem>>, vector<1x128xf32>
    %98 = arith.addf %91, %97 : vector<1x128xf32>
    %c12_i32_38 = arith.constant 12 : i32
    %99 = arith.addi %0, %c12_i32_38 : i32
    %c1_i32_39 = arith.constant 1 : i32
    %100 = arith.addi %99, %c1_i32_39 : i32
    %101 = arith.index_cast %100 : i32 to index
    %102 = memref.load %arg1[%101] : memref<512xi32, #tpu.memory_space<smem>>
    %103 = arith.index_cast %102 : i32 to index
    %c0_40 = arith.constant 0 : index
    %104 = vector.load %arg2[%103, %c0_40] : memref<16x128xf32, #tpu.memory_space<vmem>>, vector<1x128xf32>
    %105 = arith.addf %98, %104 : vector<1x128xf32>
    %c12_i32_41 = arith.constant 12 : i32
    %106 = arith.addi %0, %c12_i32_41 : i32
    %c2_i32_42 = arith.constant 2 : i32
    %107 = arith.addi %106, %c2_i32_42 : i32
    %108 = arith.index_cast %107 : i32 to index
    %109 = memref.load %arg1[%108] : memref<512xi32, #tpu.memory_space<smem>>
    %110 = arith.index_cast %109 : i32 to index
    %c0_43 = arith.constant 0 : index
    %111 = vector.load %arg2[%110, %c0_43] : memref<16x128xf32, #tpu.memory_space<vmem>>, vector<1x128xf32>
    %112 = arith.addf %105, %111 : vector<1x128xf32>
    %c12_i32_44 = arith.constant 12 : i32
    %113 = arith.addi %0, %c12_i32_44 : i32
    %c3_i32_45 = arith.constant 3 : i32
    %114 = arith.addi %113, %c3_i32_45 : i32
    %115 = arith.index_cast %114 : i32 to index
    %116 = memref.load %arg1[%115] : memref<512xi32, #tpu.memory_space<smem>>
    %117 = arith.index_cast %116 : i32 to index
    %c0_46 = arith.constant 0 : index
    %118 = vector.load %arg2[%117, %c0_46] : memref<16x128xf32, #tpu.memory_space<vmem>>, vector<1x128xf32>
    %119 = arith.addf %112, %118 : vector<1x128xf32>
    %c3 = arith.constant 3 : index
    %c0_47 = arith.constant 0 : index
    %120 = vector.load %arg3[%c3, %c0_47] : memref<8x128xf32, #tpu.memory_space<vmem>>, vector<1x128xf32>
    tpu.vector_store %arg3[%c3, %c0_47], %119 {strides = array<i32>} : memref<8x128xf32, #tpu.memory_space<vmem>>, vector<1x128xf32>,
    %cst_48 = arith.constant 0.000000e+00 : f32
    %121 = vector.broadcast %cst_48 : f32 to vector<1x128xf32>
    %c16_i32 = arith.constant 16 : i32
    %122 = arith.addi %0, %c16_i32 : i32
    %c0_i32_49 = arith.constant 0 : i32
    %123 = arith.addi %122, %c0_i32_49 : i32
    %124 = arith.index_cast %123 : i32 to index
    %125 = memref.load %arg1[%124] : memref<512xi32, #tpu.memory_space<smem>>
    %126 = arith.index_cast %125 : i32 to index
    %c0_50 = arith.constant 0 : index
    %127 = vector.load %arg2[%126, %c0_50] : memref<16x128xf32, #tpu.memory_space<vmem>>, vector<1x128xf32>
    %128 = arith.addf %121, %127 : vector<1x128xf32>
    %c16_i32_51 = arith.constant 16 : i32
    %129 = arith.addi %0, %c16_i32_51 : i32
    %c1_i32_52 = arith.constant 1 : i32
    %130 = arith.addi %129, %c1_i32_52 : i32
    %131 = arith.index_cast %130 : i32 to index
    %132 = memref.load %arg1[%131] : memref<512xi32, #tpu.memory_space<smem>>
    %133 = arith.index_cast %132 : i32 to index
    %c0_53 = arith.constant 0 : index
    %134 = vector.load %arg2[%133, %c0_53] : memref<16x128xf32, #tpu.memory_space<vmem>>, vector<1x128xf32>
    %135 = arith.addf %128, %134 : vector<1x128xf32>
    %c16_i32_54 = arith.constant 16 : i32
    %136 = arith.addi %0, %c16_i32_54 : i32
    %c2_i32_55 = arith.constant 2 : i32
    %137 = arith.addi %136, %c2_i32_55 : i32
    %138 = arith.index_cast %137 : i32 to index
    %139 = memref.load %arg1[%138] : memref<512xi32, #tpu.memory_space<smem>>
    %140 = arith.index_cast %139 : i32 to index
    %c0_56 = arith.constant 0 : index
    %141 = vector.load %arg2[%140, %c0_56] : memref<16x128xf32, #tpu.memory_space<vmem>>, vector<1x128xf32>
    %142 = arith.addf %135, %141 : vector<1x128xf32>
    %c16_i32_57 = arith.constant 16 : i32
    %143 = arith.addi %0, %c16_i32_57 : i32
    %c3_i32_58 = arith.constant 3 : i32
    %144 = arith.addi %143, %c3_i32_58 : i32
    %145 = arith.index_cast %144 : i32 to index
    %146 = memref.load %arg1[%145] : memref<512xi32, #tpu.memory_space<smem>>
    %147 = arith.index_cast %146 : i32 to index
    %c0_59 = arith.constant 0 : index
    %148 = vector.load %arg2[%147, %c0_59] : memref<16x128xf32, #tpu.memory_space<vmem>>, vector<1x128xf32>
    %149 = arith.addf %142, %148 : vector<1x128xf32>
    %c4 = arith.constant 4 : index
    %c0_60 = arith.constant 0 : index
    %150 = vector.load %arg3[%c4, %c0_60] : memref<8x128xf32, #tpu.memory_space<vmem>>, vector<1x128xf32>
    tpu.vector_store %arg3[%c4, %c0_60], %149 {strides = array<i32>} : memref<8x128xf32, #tpu.memory_space<vmem>>, vector<1x128xf32>,
    %cst_61 = arith.constant 0.000000e+00 : f32
    %151 = vector.broadcast %cst_61 : f32 to vector<1x128xf32>
    %c20_i32 = arith.constant 20 : i32
    %152 = arith.addi %0, %c20_i32 : i32
    %c0_i32_62 = arith.constant 0 : i32
    %153 = arith.addi %152, %c0_i32_62 : i32
    %154 = arith.index_cast %153 : i32 to index
    %155 = memref.load %arg1[%154] : memref<512xi32, #tpu.memory_space<smem>>
    %156 = arith.index_cast %155 : i32 to index
    %c0_63 = arith.constant 0 : index
    %157 = vector.load %arg2[%156, %c0_63] : memref<16x128xf32, #tpu.memory_space<vmem>>, vector<1x128xf32>
    %158 = arith.addf %151, %157 : vector<1x128xf32>
    %c20_i32_64 = arith.constant 20 : i32
    %159 = arith.addi %0, %c20_i32_64 : i32
    %c1_i32_65 = arith.constant 1 : i32
    %160 = arith.addi %159, %c1_i32_65 : i32
    %161 = arith.index_cast %160 : i32 to index
    %162 = memref.load %arg1[%161] : memref<512xi32, #tpu.memory_space<smem>>
    %163 = arith.index_cast %162 : i32 to index
    %c0_66 = arith.constant 0 : index
    %164 = vector.load %arg2[%163, %c0_66] : memref<16x128xf32, #tpu.memory_space<vmem>>, vector<1x128xf32>
    %165 = arith.addf %158, %164 : vector<1x128xf32>
    %c20_i32_67 = arith.constant 20 : i32
    %166 = arith.addi %0, %c20_i32_67 : i32
    %c2_i32_68 = arith.constant 2 : i32
    %167 = arith.addi %166, %c2_i32_68 : i32
    %168 = arith.index_cast %167 : i32 to index
    %169 = memref.load %arg1[%168] : memref<512xi32, #tpu.memory_space<smem>>
    %170 = arith.index_cast %169 : i32 to index
    %c0_69 = arith.constant 0 : index
    %171 = vector.load %arg2[%170, %c0_69] : memref<16x128xf32, #tpu.memory_space<vmem>>, vector<1x128xf32>
    %172 = arith.addf %165, %171 : vector<1x128xf32>
    %c20_i32_70 = arith.constant 20 : i32
    %173 = arith.addi %0, %c20_i32_70 : i32
    %c3_i32_71 = arith.constant 3 : i32
    %174 = arith.addi %173, %c3_i32_71 : i32
    %175 = arith.index_cast %174 : i32 to index
    %176 = memref.load %arg1[%175] : memref<512xi32, #tpu.memory_space<smem>>
    %177 = arith.index_cast %176 : i32 to index
    %c0_72 = arith.constant 0 : index
    %178 = vector.load %arg2[%177, %c0_72] : memref<16x128xf32, #tpu.memory_space<vmem>>, vector<1x128xf32>
    %179 = arith.addf %172, %178 : vector<1x128xf32>
    %c5 = arith.constant 5 : index
    %c0_73 = arith.constant 0 : index
    %180 = vector.load %arg3[%c5, %c0_73] : memref<8x128xf32, #tpu.memory_space<vmem>>, vector<1x128xf32>
    tpu.vector_store %arg3[%c5, %c0_73], %179 {strides = array<i32>} : memref<8x128xf32, #tpu.memory_space<vmem>>, vector<1x128xf32>,
    %cst_74 = arith.constant 0.000000e+00 : f32
    %181 = vector.broadcast %cst_74 : f32 to vector<1x128xf32>
    %c24_i32 = arith.constant 24 : i32
    %182 = arith.addi %0, %c24_i32 : i32
    %c0_i32_75 = arith.constant 0 : i32
    %183 = arith.addi %182, %c0_i32_75 : i32
    %184 = arith.index_cast %183 : i32 to index
    %185 = memref.load %arg1[%184] : memref<512xi32, #tpu.memory_space<smem>>
    %186 = arith.index_cast %185 : i32 to index
    %c0_76 = arith.constant 0 : index
    %187 = vector.load %arg2[%186, %c0_76] : memref<16x128xf32, #tpu.memory_space<vmem>>, vector<1x128xf32>
    %188 = arith.addf %181, %187 : vector<1x128xf32>
    %c24_i32_77 = arith.constant 24 : i32
    %189 = arith.addi %0, %c24_i32_77 : i32
    %c1_i32_78 = arith.constant 1 : i32
    %190 = arith.addi %189, %c1_i32_78 : i32
    %191 = arith.index_cast %190 : i32 to index
    %192 = memref.load %arg1[%191] : memref<512xi32, #tpu.memory_space<smem>>
    %193 = arith.index_cast %192 : i32 to index
    %c0_79 = arith.constant 0 : index
    %194 = vector.load %arg2[%193, %c0_79] : memref<16x128xf32, #tpu.memory_space<vmem>>, vector<1x128xf32>
    %195 = arith.addf %188, %194 : vector<1x128xf32>
    %c24_i32_80 = arith.constant 24 : i32
    %196 = arith.addi %0, %c24_i32_80 : i32
    %c2_i32_81 = arith.constant 2 : i32
    %197 = arith.addi %196, %c2_i32_81 : i32
    %198 = arith.index_cast %197 : i32 to index
    %199 = memref.load %arg1[%198] : memref<512xi32, #tpu.memory_space<smem>>
    %200 = arith.index_cast %199 : i32 to index
    %c0_82 = arith.constant 0 : index
    %201 = vector.load %arg2[%200, %c0_82] : memref<16x128xf32, #tpu.memory_space<vmem>>, vector<1x128xf32>
    %202 = arith.addf %195, %201 : vector<1x128xf32>
    %c24_i32_83 = arith.constant 24 : i32
    %203 = arith.addi %0, %c24_i32_83 : i32
    %c3_i32_84 = arith.constant 3 : i32
    %204 = arith.addi %203, %c3_i32_84 : i32
    %205 = arith.index_cast %204 : i32 to index
    %206 = memref.load %arg1[%205] : memref<512xi32, #tpu.memory_space<smem>>
    %207 = arith.index_cast %206 : i32 to index
    %c0_85 = arith.constant 0 : index
    %208 = vector.load %arg2[%207, %c0_85] : memref<16x128xf32, #tpu.memory_space<vmem>>, vector<1x128xf32>
    %209 = arith.addf %202, %208 : vector<1x128xf32>
    %c6 = arith.constant 6 : index
    %c0_86 = arith.constant 0 : index
    %210 = vector.load %arg3[%c6, %c0_86] : memref<8x128xf32, #tpu.memory_space<vmem>>, vector<1x128xf32>
    tpu.vector_store %arg3[%c6, %c0_86], %209 {strides = array<i32>} : memref<8x128xf32, #tpu.memory_space<vmem>>, vector<1x128xf32>,
    %cst_87 = arith.constant 0.000000e+00 : f32
    %211 = vector.broadcast %cst_87 : f32 to vector<1x128xf32>
    %c28_i32 = arith.constant 28 : i32
    %212 = arith.addi %0, %c28_i32 : i32
    %c0_i32_88 = arith.constant 0 : i32
    %213 = arith.addi %212, %c0_i32_88 : i32
    %214 = arith.index_cast %213 : i32 to index
    %215 = memref.load %arg1[%214] : memref<512xi32, #tpu.memory_space<smem>>
    %216 = arith.index_cast %215 : i32 to index
    %c0_89 = arith.constant 0 : index
    %217 = vector.load %arg2[%216, %c0_89] : memref<16x128xf32, #tpu.memory_space<vmem>>, vector<1x128xf32>
    %218 = arith.addf %211, %217 : vector<1x128xf32>
    %c28_i32_90 = arith.constant 28 : i32
    %219 = arith.addi %0, %c28_i32_90 : i32
    %c1_i32_91 = arith.constant 1 : i32
    %220 = arith.addi %219, %c1_i32_91 : i32
    %221 = arith.index_cast %220 : i32 to index
    %222 = memref.load %arg1[%221] : memref<512xi32, #tpu.memory_space<smem>>
    %223 = arith.index_cast %222 : i32 to index
    %c0_92 = arith.constant 0 : index
    %224 = vector.load %arg2[%223, %c0_92] : memref<16x128xf32, #tpu.memory_space<vmem>>, vector<1x128xf32>
    %225 = arith.addf %218, %224 : vector<1x128xf32>
    %c28_i32_93 = arith.constant 28 : i32
    %226 = arith.addi %0, %c28_i32_93 : i32
    %c2_i32_94 = arith.constant 2 : i32
    %227 = arith.addi %226, %c2_i32_94 : i32
    %228 = arith.index_cast %227 : i32 to index
    %229 = memref.load %arg1[%228] : memref<512xi32, #tpu.memory_space<smem>>
    %230 = arith.index_cast %229 : i32 to index
    %c0_95 = arith.constant 0 : index
    %231 = vector.load %arg2[%230, %c0_95] : memref<16x128xf32, #tpu.memory_space<vmem>>, vector<1x128xf32>
    %232 = arith.addf %225, %231 : vector<1x128xf32>
    %c28_i32_96 = arith.constant 28 : i32
    %233 = arith.addi %0, %c28_i32_96 : i32
    %c3_i32_97 = arith.constant 3 : i32
    %234 = arith.addi %233, %c3_i32_97 : i32
    %235 = arith.index_cast %234 : i32 to index
    %236 = memref.load %arg1[%235] : memref<512xi32, #tpu.memory_space<smem>>
    %237 = arith.index_cast %236 : i32 to index
    %c0_98 = arith.constant 0 : index
    %238 = vector.load %arg2[%237, %c0_98] : memref<16x128xf32, #tpu.memory_space<vmem>>, vector<1x128xf32>
    %239 = arith.addf %232, %238 : vector<1x128xf32>
    %c7 = arith.constant 7 : index
    %c0_99 = arith.constant 0 : index
    %240 = vector.load %arg3[%c7, %c0_99] : memref<8x128xf32, #tpu.memory_space<vmem>>, vector<1x128xf32>
    tpu.vector_store %arg3[%c7, %c0_99], %239 {strides = array<i32>} : memref<8x128xf32, #tpu.memory_space<vmem>>, vector<1x128xf32>,
    return
  }
  func.func @transform_0(%arg0: i32, %arg1: memref<512xi32, #tpu.memory_space<smem>>) -> (i32, i32) {
    %c0_i32 = arith.constant 0 : i32
    %c0_i32_0 = arith.constant 0 : i32
    %c0_i32_1 = arith.constant 0 : i32
    return %c0_i32, %c0_i32_0 : i32, i32
  }
  func.func @transform_1(%arg0: i32, %arg1: memref<512xi32, #tpu.memory_space<smem>>) -> (i32, i32) {
    %c0_i32 = arith.constant 0 : i32
    %c0_i32_0 = arith.constant 0 : i32
    return %arg0, %c0_i32 : i32, i32
  }
}

</mosaic_0001>

<bundles_post_ra>
// kernel: tpu_custom_call.1
= control target key start
LH: loop header
LB: loop body
LE: loop exit
PB: predicated region body
PF: predicated region fallthrough
CT: control target
= control target key end

     0   :  { %s572_s12 = smov [#allocation3]   ;;  %s737_s0 = inlined_call_operand.hbm [shape: s32[512], index: 0, kind: input, shape index: {}]   ;;  %s738_s1 = inlined_call_operand.hbm [shape: f32[16,128], index: 1, kind: input, shape index: {}]   ;;  %s739_s2 = inlined_call_operand.hbm [shape: f32[128,128], index: 2, kind: output, shape index: {}]  }
   0x1   :  { %s8_s11 = sshll.u32 %s737_s0, 4  ;;  %s9_s11 = int_to_ptr.hbm [resolvable:$true] %s8_s11 }
   0x2   :  { %11 = dma.hbm_to_smem %s9_s11, 64, %s572_s12, [#allocation2] }
   0x3   :  { %546 = dma.done.wait [#allocation2], 64 }
   0x4   :  { %547 = vsyncadd [#allocation2], 4294967232 }
   0x5   :  { %14 = sfence }
   0x6   :  { %15 = vsyncpa [#allocation5], 0 }
   0x7   :  { %16 = vsyncpa [#allocation6], 0 }
   0x8   :  { %18 = vsyncpa [#allocation6 + $0x1], 0  ;;  %s594_s13 = smov 0   ;;  %s596_s14 = smov 0  }
   0x9   :  { %s598_s15 = smov 0   ;;  %s600_s16 = smov 0  }
   0xa LB: > { %s615_s0 = sadd.s32 4294967295, %s570_s16   ;;  %s396_s17 = sadd.s32 4294967294, %s570_s16   ;;  %s570_s16 = sphi %s600_s16, %s745_s16   ;;  %s566_s15 = sphi %s598_s15, %s744_s15   ;;  %s562_s14 = sphi %s596_s14, %s743_s14   ;;  %s558_s13 = sphi %s594_s13, %s742_s13  }
   0xb   : > { %s619_s18 = sadd.s32 1, %s570_s16   ;;  %s52_s19 = sadd.s32 1, %s566_s15 }
   0xc   : > { %s49_s20 = ssub.s32 %s570_s16, %s619_s18  ;;  %p62_p0 = scmp.ne.s32.totalorder %s566_s15, %s562_s14 }
   0xd   : > { %p50_p1 = scmp.eq.s32.totalorder %s49_s20, 0  ;;  %p63_p2 = scmp.eq.s32.totalorder %s615_s0, 15 }
   0xe   : > { %p68_p3 = scmp.ne.s32.totalorder %s562_s14, %s558_s13  ;;  %p69_p4 = scmp.eq.s32.totalorder %s396_s17, 15 }
   0xf   : > { %s630_s21 = scalar_select %p50_p1, %s566_s15, %s52_s19  }
  0x10   : > { %p632_p5 = por %p63_p2, %p62_p0  ;;  %p636_p6 = por %p69_p4, %p68_p3 }
  0x11   : > { %p397_p7 = scmp.ge.s32.totalorder %s570_s16, 1  ;;  %p76_p8 = scmp.lt.s32.totalorder %s570_s16, 17 }
  0x12   : > { %p421_p9 = scmp.eq.s32.totalorder %s615_s0, 0  ;;  %s87_s26 = sshll.u32 %s738_s1, 4  ;;  %s88_s26 = int_to_ptr.hbm [resolvable:$true] %s87_s26 }
  0x13   : > { %p77_p10 = pnand %p397_p7, %p76_p8  ;;  %s573_s27 = smov [#allocation4]  }
  0x14   : > { %s89_s28 = sshll.u32 %s573_s27, 4  ;;  %s574_s29 = smov 128   ;;  %s90_s28 = int_to_ptr.vmem [resolvable:$true] %s89_s28 }
  0x15   : > { %p413_p11 = pneg %p77_p10  ;;  %s575_s30 = smov 8  }
  0x16   : > { %105 = sbr.rel (%p77_p10) target bundleno = 91 (0x5b), region = 24 }
  0x17   : > { %p414_p12 = pnand %p421_p9, %p413_p11 }
  0x19   : > { %416 = dma.hbm_to_vmem [thread:$0]  (!%p414_p12), %s88_s26, 256, %s90_s28, [#allocation5], %s574_s29, %s574_s29, %s575_s30  }
  0x1b   : > { %549 = dma.done.wait (%p421_p9), [#allocation5], 256  }
  0x1c   : > { %551 = vsyncadd (%p421_p9), [#allocation5], 4294967040  ;;  %s118_s3 = sand.u32 1, %s562_s14   ;;  %s654_s4 = sshll.u32 %s615_s0, 5 }
  0x1d   : > { %s122_s5 = sld [smem:[#allocation3 + %s654_s4]]  ;;  %s659_s6 = sshll.u32 %s118_s3, 3 }
  0x1e   : > { %s126_s7 = sadd.s32 1, %s654_s4  ;;  %s131_s9 = sadd.s32 2, %s654_s4 }
  0x1f   : > { %s127_s8 = sld [smem:[#allocation3 + %s126_s7]]  ;;  %s136_s11 = sadd.s32 3, %s654_s4 }
  0x20   : > { %s132_s10 = sld [smem:[#allocation3 + %s131_s9]]  ;;  %s142_s17 = sadd.s32 4, %s654_s4 }
  0x21   : > { %s137_s12 = sld [smem:[#allocation3 + %s136_s11]]  ;;  %s147_s19 = sadd.s32 5, %s654_s4 }
  0x22   : > { %s143_s20 = sld [smem:[#allocation3 + %s142_s17]]  ;;  %s152_s26 = sadd.s32 6, %s654_s4 }
  0x23   : > { %s123_s24 = scalar_lea.vmem [#allocation4], %s122_s5  ;;  %s148_s25 = sld [smem:[#allocation3 + %s147_s19]] }
  0x24   : > { %v124_v0 = vld [vmem:[%s123_s24] sm:$0x1]  ;;  %s153_s27 = sld [smem:[#allocation3 + %s152_s26]]  ;;  %s157_s29 = sadd.s32 7, %s654_s4 }
  0x25   : > { %s128_s28 = scalar_lea.vmem [#allocation4], %s127_s8  ;;  %s158_s7 = sld [smem:[#allocation3 + %s157_s29]] }
  0x26   : > { %v129_v1 = vld [vmem:[%s128_s28] sm:$0x1]  ;;  %s133_s30 = scalar_lea.vmem [#allocation4], %s132_s10  ;;  %s163_s11 = sadd.s32 8, %s654_s4 }
  0x27   : > { %v130_v2 = vadd.f32 %v129_v1, %v124_v0  ;;  %v134_v3 = vld [vmem:[%s133_s30] sm:$0x1]  ;;  %s138_s9 = scalar_lea.vmem [#allocation4], %s137_s12  ;;  %s168_s17 = sadd.s32 9, %s654_s4 }
  0x28   : > { %v139_v4 = vld [vmem:[%s138_s9] sm:$0x1]  ;;  %s164_s5 = sld [smem:[#allocation3 + %s163_s11]]  ;;  %s144_s24 = scalar_lea.vmem [#allocation4], %s143_s20 }
  0x29   : > { %v135_v5 = vadd.f32 %v134_v3, %v130_v2  ;;  %v145_v6 = vld [vmem:[%s144_s24] sm:$0x1]  ;;  %s169_s19 = sld [smem:[#allocation3 + %s168_s17]]  ;;  %s149_s8 = scalar_lea.vmem [#allocation4], %s148_s25 }
  0x2a   : > { %v150_v8 = vld [vmem:[%s149_s8] sm:$0x1]  ;;  %s173_s26 = sadd.s32 10, %s654_s4  ;;  %s154_s10 = scalar_lea.vmem [#allocation4], %s153_s27 }
  0x2b   : > { %v140_v7 = vadd.f32 %v139_v4, %v135_v5  ;;  %v151_v9 = vadd.f32 %v150_v8, %v145_v6  ;;  %v155_v10 = vld [vmem:[%s154_s10] sm:$0x1]  ;;  %s174_s12 = sld [smem:[#allocation3 + %s173_s26]]  ;;  %s178_s28 = sadd.s32 11, %s654_s4 }
  0x2c   : > { %s673_s29 = scalar_lea.vmem [#allocation7], %s659_s6  ;;  %s179_s20 = sld [smem:[#allocation3 + %s178_s28]] }
  0x2d   : > { %141 = vst [vmem:[%s673_s29] sm:$0x1] %v140_v7  ;;  %v156_v11 = vadd.f32 %v155_v10, %v151_v9  ;;  %s159_s30 = scalar_lea.vmem [#allocation4], %s158_s7  ;;  %s184_s9 = sadd.s32 12, %s654_s4 }
  0x2e   : > { %v160_v12 = vld [vmem:[%s159_s30] sm:$0x1]  ;;  %s189_s25 = sadd.s32 13, %s654_s4  ;;  %s185_s11 = sld [smem:[#allocation3 + %s184_s9]] }
  0x2f   : > { %v161_v13 = vadd.f32 %v160_v12, %v156_v11  ;;  %s165_s17 = scalar_lea.vmem [#allocation4], %s164_s5  ;;  %s190_s27 = sld [smem:[#allocation3 + %s189_s25]] }
  0x30   : > { %v166_v14 = vld [vmem:[%s165_s17] sm:$0x1]  ;;  %s170_s24 = scalar_lea.vmem [#allocation4], %s169_s19  ;;  %s194_s6 = sadd.s32 14, %s654_s4 }
  0x31   : > { %v171_v15 = vld [vmem:[%s170_s24] sm:$0x1]  ;;  %s199_s8 = sadd.s32 15, %s654_s4  ;;  %162 = vst [vmem:[%s673_s29 + $0x1] sm:$0x1] %v161_v13  ;;  %s195_s26 = sld [smem:[#allocation3 + %s194_s6]] }
  0x32   : > { %v172_v16 = vadd.f32 %v171_v15, %v166_v14  ;;  %s175_s10 = scalar_lea.vmem [#allocation4], %s174_s12  ;;  %s200_s7 = sld [smem:[#allocation3 + %s199_s8]] }
  0x33   : > { %v176_v17 = vld [vmem:[%s175_s10] sm:$0x1]  ;;  %s180_s28 = scalar_lea.vmem [#allocation4], %s179_s20  ;;  %s205_s5 = sadd.s32 16, %s654_s4 }
  0x34   : > { %v177_v18 = vadd.f32 %v176_v17, %v172_v16  ;;  %v181_v19 = vld [vmem:[%s180_s28] sm:$0x1]  ;;  %s210_s30 = sadd.s32 17, %s654_s4  ;;  %s206_s9 = sld [smem:[#allocation3 + %s205_s5]] }
  0x35   : > { %s186_s19 = scalar_lea.vmem [#allocation4], %s185_s11  ;;  %s211_s25 = sld [smem:[#allocation3 + %s210_s30]] }
  0x36   : > { %v182_v20 = vadd.f32 %v181_v19, %v177_v18  ;;  %v187_v21 = vld [vmem:[%s186_s19] sm:$0x1]  ;;  %s191_s17 = scalar_lea.vmem [#allocation4], %s190_s27  ;;  %s215_s24 = sadd.s32 18, %s654_s4 }
  0x37   : > { %v192_v22 = vld [vmem:[%s191_s17] sm:$0x1]  ;;  %s220_s12 = sadd.s32 19, %s654_s4  ;;  %s216_s6 = sld [smem:[#allocation3 + %s215_s24]] }
  0x38   : > { %183 = vst [vmem:[%s673_s29 + $0x2] sm:$0x1] %v182_v20  ;;  %v193_v23 = vadd.f32 %v192_v22, %v187_v21  ;;  %s196_s8 = scalar_lea.vmem [#allocation4], %s195_s26  ;;  %s221_s20 = sld [smem:[#allocation3 + %s220_s12]] }
  0x39   : > { %v197_v24 = vld [vmem:[%s196_s8] sm:$0x1]  ;;  %s201_s10 = scalar_lea.vmem [#allocation4], %s200_s7  ;;  %s226_s11 = sadd.s32 20, %s654_s4 }
  0x3a   : > { %v198_v25 = vadd.f32 %v197_v24, %v193_v23  ;;  %v202_v26 = vld [vmem:[%s201_s10] sm:$0x1]  ;;  %s231_s28 = sadd.s32 21, %s654_s4  ;;  %s227_s5 = sld [smem:[#allocation3 + %s226_s11]] }
  0x3b   : > { %s207_s27 = scalar_lea.vmem [#allocation4], %s206_s9  ;;  %s232_s30 = sld [smem:[#allocation3 + %s231_s28]] }
  0x3c   : > { %v203_v27 = vadd.f32 %v202_v26, %v198_v25  ;;  %v208_v28 = vld [vmem:[%s207_s27] sm:$0x1]  ;;  %s212_s19 = scalar_lea.vmem [#allocation4], %s211_s25  ;;  %s236_s17 = sadd.s32 22, %s654_s4 }
  0x3d   : > { %v213_v29 = vld [vmem:[%s212_s19] sm:$0x1]  ;;  %s241_s26 = sadd.s32 23, %s654_s4  ;;  %s237_s24 = sld [smem:[#allocation3 + %s236_s17]] }
  0x3e   : > { %204 = vst [vmem:[%s673_s29 + $0x3] sm:$0x1] %v203_v27  ;;  %v214_v30 = vadd.f32 %v213_v29, %v208_v28  ;;  %s217_s12 = scalar_lea.vmem [#allocation4], %s216_s6  ;;  %s242_s7 = sld [smem:[#allocation3 + %s241_s26]] }
  0x3f   : > { %v218_v31 = vld [vmem:[%s217_s12] sm:$0x1]  ;;  %s222_s8 = scalar_lea.vmem [#allocation4], %s221_s20  ;;  %s247_s9 = sadd.s32 24, %s654_s4 }
  0x40   : > { %v219_v32 = vadd.f32 %v218_v31, %v214_v30  ;;  %v223_v33 = vld [vmem:[%s222_s8] sm:$0x1]  ;;  %s252_s10 = sadd.s32 25, %s654_s4  ;;  %s248_s11 = sld [smem:[#allocation3 + %s247_s9]] }
  0x41   : > { %s228_s25 = scalar_lea.vmem [#allocation4], %s227_s5  ;;  %s253_s28 = sld [smem:[#allocation3 + %s252_s10]] }
  0x42   : > { %v224_v34 = vadd.f32 %v223_v33, %v219_v32  ;;  %v229_v35 = vld [vmem:[%s228_s25] sm:$0x1]  ;;  %s233_s27 = scalar_lea.vmem [#allocation4], %s232_s30  ;;  %s257_s19 = sadd.s32 26, %s654_s4 }
  0x43   : > { %v234_v36 = vld [vmem:[%s233_s27] sm:$0x1]  ;;  %s262_s6 = sadd.s32 27, %s654_s4  ;;  %s258_s17 = sld [smem:[#allocation3 + %s257_s19]] }
  0x44   : > { %225 = vst [vmem:[%s673_s29 + $0x4] sm:$0x1] %v224_v34  ;;  %v235_v37 = vadd.f32 %v234_v36, %v229_v35  ;;  %s238_s26 = scalar_lea.vmem [#allocation4], %s237_s24  ;;  %s263_s20 = sld [smem:[#allocation3 + %s262_s6]] }
  0x45   : > { %v239_v38 = vld [vmem:[%s238_s26] sm:$0x1]  ;;  %s243_s12 = scalar_lea.vmem [#allocation4], %s242_s7  ;;  %s268_s5 = sadd.s32 28, %s654_s4 }
  0x46   : > { %v240_v39 = vadd.f32 %v239_v38, %v235_v37  ;;  %v244_v40 = vld [vmem:[%s243_s12] sm:$0x1]  ;;  %s273_s8 = sadd.s32 29, %s654_s4  ;;  %s269_s9 = sld [smem:[#allocation3 + %s268_s5]] }
  0x47   : > { %s249_s30 = scalar_lea.vmem [#allocation4], %s248_s11  ;;  %s274_s10 = sld [smem:[#allocation3 + %s273_s8]] }
  0x48   : > { %v245_v41 = vadd.f32 %v244_v40, %v240_v39  ;;  %v250_v42 = vld [vmem:[%s249_s30] sm:$0x1]  ;;  %s254_s25 = scalar_lea.vmem [#allocation4], %s253_s28  ;;  %s278_s27 = sadd.s32 30, %s654_s4 }
  0x49   : > { %v255_v43 = vld [vmem:[%s254_s25] sm:$0x1]  ;;  %s283_s19 = sadd.s32 31, %s654_s4  ;;  %s279_s24 = sld [smem:[#allocation3 + %s278_s27]] }
  0x4a   : > { %246 = vst [vmem:[%s673_s29 + $0x5] sm:$0x1] %v245_v41  ;;  %v256_v44 = vadd.f32 %v255_v43, %v250_v42  ;;  %s259_s6 = scalar_lea.vmem [#allocation4], %s258_s17  ;;  %s284_s7 = sld [smem:[#allocation3 + %s283_s19]] }
  0x4b   : > { %v260_v45 = vld [vmem:[%s259_s6] sm:$0x1]  ;;  %s264_s26 = scalar_lea.vmem [#allocation4], %s263_s20  ;;  %s404_s12 = sshll.u32 %s615_s0, 3 }
  0x4c   : > { %v261_v46 = vadd.f32 %v260_v45, %v256_v44  ;;  %v265_v47 = vld [vmem:[%s264_s26] sm:$0x1]  ;;  %s270_s11 = scalar_lea.vmem [#allocation4], %s269_s9  ;;  %s300_s4 = scalar_lea.hbm %s739_s2, %s404_s12 }
  0x4d   : > { %v271_v49 = vld [vmem:[%s270_s11] sm:$0x1]  ;;  %s275_s8 = scalar_lea.vmem [#allocation4], %s274_s10  ;;  %s302_s17 = sshll.u32 %s673_s29, 4  ;;  %s303_s17 = int_to_ptr.vmem [resolvable:$true] %s302_s17 }
  0x4e   : > { %v266_v48 = vadd.f32 %v265_v47, %v261_v46  ;;  %v276_v50 = vld [vmem:[%s275_s8] sm:$0x1]  ;;  %s304_s20 = sshll.u32 %s300_s4, 4  ;;  %s290_s9 = scalar_lea.sflag [#allocation6], %s118_s3  ;;  %s305_s20 = int_to_ptr.hbm [resolvable:$true] %s304_s20 }
  0x4f   : > { %v277_v51 = vadd.f32 %v276_v50, %v271_v49  ;;  %s280_s30 = scalar_lea.vmem [#allocation4], %s279_s24  ;;  %s516_s25 = sshra.s32 %s305_s20, 4  ;;  %s517_s25 = int_to_ptr.hbm [resolvable:$true] %s516_s25 }
  0x50   : > { %267 = vst [vmem:[%s673_s29 + $0x6] sm:$0x1] %v266_v48  ;;  %v281_v52 = vld [vmem:[%s280_s30] sm:$0x1]  ;;  %s285_s0 = scalar_lea.vmem [#allocation4], %s284_s7  ;;  %s518_s10 = scalar_lea.hbm %s517_s25, 8 }
  0x51   : > { %v282_v53 = vadd.f32 %v281_v52, %v277_v51  ;;  %v286_v54 = vld [vmem:[%s285_s0] sm:$0x1]  ;;  %p519_p13 = scmp.ne.s32.totalorder %s517_s25, %s518_s10  ;;  %s522_s24 = scalar_lea.hbm %s739_s2, 128 }
  0x52   : > { %p523_p2 = scmp.lt.s32.totalorder %s517_s25, %s739_s2  ;;  %p524_p3 = scmp.lt.s32.totalorder %s522_s24, %s518_s10 }
  0x53   : > { %v287_v55 = vadd.f32 %v286_v54, %v282_v53  ;;  %p520_p0 = pnand %p519_p13, %p632_p5 }
  0x54   : > { %p525_p4 = por %p524_p3, %p523_p2 }
  0x55   : > { %288 = vst [vmem:[%s673_s29 + $0x7] sm:$0x1] %v287_v55  ;;  %p521_p1 = pneg %p520_p0 }
  0x57   : > { %p526_p7 = pnand %p525_p4, %p521_p1 }
  0x59   : > { %529 = shalt.err (!%p526_p7)
}
  0x5a   : > { %411 = dma.vmem_to_hbm [thread:$0]  (%p632_p5), %s303_s17, 128, %s305_s20, %s290_s9  }
  0x5b PF: > { %p423_p8 = scmp.ge.s32.totalorder %s570_s16, 2  ;;  %s316_s3 = sand.u32 1, %s558_s13  }
  0x5c   : > { %s317_s29 = scalar_lea.sflag [#allocation6], %s316_s3 }
  0x5d   : > { %p418_p9 = pnand %p423_p8, %p636_p6 }
  0x5f   : > { %p419_p10 = pneg %p418_p9 }
  0x61   : > { %553 = dma.done.wait (%p419_p10), %s317_s29, 128  }
  0x62   : > { %555 = vsyncadd (%p419_p10), %s317_s29, 4294967168  ;;  %p21_p11 = scmp.ge.s32.totalorder %s619_s18, 18   ;;  %s742_s13 = smov %s562_s14 }
  0x63   : > { %s743_s14 = smov %s566_s15  ;;  %s744_s15 = smov %s630_s21 }
  0x64   : > { %s745_s16 = smov %s619_s18  ;;  %23 = sbr.rel (!%p21_p11) target bundleno = 10 (0xa), region = 93 }
  0x69   :  { %323 = vsyncpa [#allocation5], 1 }
  0x6a   :  { %325 = vsyncpa [#allocation5 + $0x1], 1 }
  0x6b   :  { %326 = vsyncpa [#allocation6], 1 }
  0x6c   :  { %328 = vsyncpa [#allocation6 + $0x1], 1 }

</bundles_post_ra>
